<compile_context>
chip_gen: v5e
topology: v5e:2x2
jax: 0.10.0
libtpu: 0.0.40
codegen_flags: <defaults>
</compile_context>

<pallas_src>
import jax
import jax.numpy as jnp
from jax.experimental import pallas as pl
from jax.experimental.pallas import tpu as pltpu


IN_FEATURES = 28 * 28   # 784 (full-dim block; Mosaic masks the lane tail)
H1 = 128
H2 = 256
N_OUT = 10
N_PAD = 128             # logits lane-padded to a full 128-lane tile


def mlp_kernel(x_ref, w1_ref, b1_ref, w2_ref, b2_ref, w3_ref, b3_ref, o_ref):
    # x arrives f32 straight from HBM; cast to bf16 in-kernel (cheap VPU work)
    # so the MXU runs at bf16 rate with f32 accumulation.
    x = x_ref[...].astype(jnp.bfloat16)
    # fc1 + ReLU
    h1 = jnp.dot(x, w1_ref[...], preferred_element_type=jnp.float32)
    h1 = jnp.maximum(h1 + b1_ref[...], 0.0).astype(jnp.bfloat16)
    # fc2 + ReLU
    h2 = jnp.dot(h1, w2_ref[...], preferred_element_type=jnp.float32)
    h2 = jnp.maximum(h2 + b2_ref[...], 0.0).astype(jnp.bfloat16)
    # fc3 (logits, lane-padded to 128 -> unmasked lane-dense store)
    o_ref[...] = (jnp.dot(h2, w3_ref[...], preferred_element_type=jnp.float32)
                  + b3_ref[...]).astype(o_ref.dtype)


def _round_up(x, m):
    return (x + m - 1) // m * m


def _pick_batch_tile(B):
    # Large tiles amortize the ~0.35 us per-grid-step overhead; cap at about
    # half the batch so the grid keeps >= 2 steps (v7x megacore), and at 1024
    # rows so double-buffered f32 x tiles + intermediates stay well inside the
    # 32 MiB VMEM budget. Tile rows must be a multiple of 8 (sublane rule).
    tb = _round_up(max(pl.cdiv(B, 2), 8), 8)
    return min(1024, tb)


def mlp_forward(x_nchw, params):
    w1, b1, w2, b2, w3, b3 = params
    B = x_nchw.shape[0]
    # Same as torch x.view(-1, 784); a free reshape, no HBM copy of x beyond it.
    x = x_nchw.reshape(B, IN_FEATURES)

    # Weights/biases are tiny (<0.5 MiB total): cast / lane-pad them in the
    # wrapper (one-time negligible work). Biases stay f32 (added on the f32
    # accumulator inside the kernel).
    w1b = w1.astype(jnp.bfloat16)
    w2b = w2.astype(jnp.bfloat16)
    w3b = jnp.pad(w3, ((0, 0), (0, N_PAD - N_OUT))).astype(jnp.bfloat16)
    b3p = jnp.pad(b3, ((0, 0), (0, N_PAD - N_OUT)))

    TB = _pick_batch_tile(B)
    grid = (pl.cdiv(B, TB),)   # partial last tile is fine: rows are independent

    flops = 2 * B * (IN_FEATURES * H1 + H1 * H2 + H2 * N_PAD)
    bytes_accessed = (B * IN_FEATURES * 4                                 # x (f32)
                      + (IN_FEATURES * H1 + H1 * H2 + H2 * N_PAD) * 2     # bf16 weights
                      + (H1 + H2 + N_PAD) * 4                             # f32 biases
                      + B * N_PAD * 2)                                    # bf16 logits

    out = pl.pallas_call(
        mlp_kernel,
        out_shape=jax.ShapeDtypeStruct((B, N_PAD), jnp.bfloat16),
        grid=grid,
        in_specs=[
            pl.BlockSpec((TB, IN_FEATURES), lambda i: (i, 0)),  # x tile (pipelined)
            pl.BlockSpec((IN_FEATURES, H1), lambda i: (0, 0)),  # w1 (VMEM-resident)
            pl.BlockSpec((1, H1), lambda i: (0, 0)),            # b1
            pl.BlockSpec((H1, H2), lambda i: (0, 0)),           # w2
            pl.BlockSpec((1, H2), lambda i: (0, 0)),            # b2
            pl.BlockSpec((H2, N_PAD), lambda i: (0, 0)),        # w3 (lane-padded)
            pl.BlockSpec((1, N_PAD), lambda i: (0, 0)),         # b3 (lane-padded)
        ],
        out_specs=pl.BlockSpec((TB, N_PAD), lambda i: (i, 0)),
        compiler_params=pltpu.CompilerParams(
            dimension_semantics=("parallel",),
            vmem_limit_bytes=32 * 1024 * 1024,
        ),
        cost_estimate=pl.CostEstimate(
            flops=flops, transcendentals=0, bytes_accessed=bytes_accessed),
    )(x, w1b, b1, w2b, b2, w3b, b3p)

    # Strip lane padding (and any partial-tile rows never written back) and
    # return f32 logits like the torch module.
    return out[:B, :N_OUT].astype(jnp.float32)


def init_params(key):
    # Deterministic init mimicking nn.Linear's uniform(-1/sqrt(fan_in), +1/sqrt(fan_in)).
    def linear(key, fan_in, fan_out):
        kw, kb = jax.random.split(key)
        bound = 1.0 / jnp.sqrt(fan_in)
        w = jax.random.uniform(kw, (fan_in, fan_out), jnp.float32, -bound, bound)
        b = jax.random.uniform(kb, (1, fan_out), jnp.float32, -bound, bound)
        return w, b

    k1, k2, k3 = jax.random.split(key, 3)
    w1, b1 = linear(k1, IN_FEATURES, H1)
    w2, b2 = linear(k2, H1, H2)
    w3, b3 = linear(k3, H2, N_OUT)
    return w1, b1, w2, b2, w3, b3


def reference_forward(x_nchw, params):
    # Mirrors the kernel's precision (bf16 matmul operands, f32 accumulate).
    w1, b1, w2, b2, w3, b3 = params
    x = x_nchw.reshape(x_nchw.shape[0], IN_FEATURES).astype(jnp.bfloat16)
    h1 = jnp.dot(x, w1.astype(jnp.bfloat16),
                 preferred_element_type=jnp.float32) + b1
    h1 = jnp.maximum(h1, 0.0).astype(jnp.bfloat16)
    h2 = jnp.dot(h1, w2.astype(jnp.bfloat16),
                 preferred_element_type=jnp.float32) + b2
    h2 = jnp.maximum(h2, 0.0).astype(jnp.bfloat16)
    return jnp.dot(h2, w3.astype(jnp.bfloat16),
                   preferred_element_type=jnp.float32) + b3


if __name__ == "__main__":
    key = jax.random.PRNGKey(0)
    k_x, k_p = jax.random.split(key)

    # Small MNIST-like batch: (B=2, C=1, H=28, W=28) NCHW
    x = jax.random.normal(k_x, (2, 1, 28, 28), jnp.float32)
    params = init_params(k_p)

    out = mlp_forward(x, params)
    out = jax.block_until_ready(out)

    ref = reference_forward(x, params)
    assert out.shape == (2, 10)
    assert jnp.allclose(out, ref, atol=2e-2, rtol=2e-2)

    print("KERNEL_OK")
</pallas_src>

<mosaic_0001>
module attributes {stable_mosaic.version = 11 : i64} {
  func.func @mlp_kernel(%arg0: i32, %arg1: memref<8x784xf32, #tpu.memory_space<vmem>>, %arg2: memref<784x128xbf16, #tpu.memory_space<vmem>>, %arg3: memref<1x128xf32, #tpu.memory_space<vmem>>, %arg4: memref<128x256xbf16, #tpu.memory_space<vmem>>, %arg5: memref<1x256xf32, #tpu.memory_space<vmem>>, %arg6: memref<256x128xbf16, #tpu.memory_space<vmem>>, %arg7: memref<1x128xf32, #tpu.memory_space<vmem>>, %arg8: memref<8x128xbf16, #tpu.memory_space<vmem>>) attributes {dimension_semantics = [#tpu.dimension_semantics<parallel>], iteration_bounds = array<i64: 1>, scalar_prefetch = 0 : i64, scratch_operands = 0 : i64, tpu.core_type = #tpu.core_type<tc>, window_params = [{transform_indices = @transform_0, window_bounds = array<i64: 8, 784>}, {pipeline_mode = #tpu.pipeline_mode<synchronous>, transform_indices = @transform_1, window_bounds = array<i64: 784, 128>}, {pipeline_mode = #tpu.pipeline_mode<synchronous>, transform_indices = @transform_2, window_bounds = array<i64: 1, 128>}, {pipeline_mode = #tpu.pipeline_mode<synchronous>, transform_indices = @transform_3, window_bounds = array<i64: 128, 256>}, {pipeline_mode = #tpu.pipeline_mode<synchronous>, transform_indices = @transform_4, window_bounds = array<i64: 1, 256>}, {pipeline_mode = #tpu.pipeline_mode<synchronous>, transform_indices = @transform_5, window_bounds = array<i64: 256, 128>}, {pipeline_mode = #tpu.pipeline_mode<synchronous>, transform_indices = @transform_6, window_bounds = array<i64: 1, 128>}, {transform_indices = @transform_7, window_bounds = array<i64: 8, 128>}]} {
    %c0 = arith.constant 0 : index
    %c0_0 = arith.constant 0 : index
    %0 = vector.load %arg1[%c0, %c0_0] : memref<8x784xf32, #tpu.memory_space<vmem>>, vector<8x784xf32>
    %1 = arith.truncf %0 : vector<8x784xf32> to vector<8x784xbf16>
    %c0_1 = arith.constant 0 : index
    %c0_2 = arith.constant 0 : index
    %2 = vector.load %arg2[%c0_1, %c0_2] : memref<784x128xbf16, #tpu.memory_space<vmem>>, vector<784x128xbf16>
    %cst = arith.constant dense<0.000000e+00> : vector<8x128xf32>
    %3 = tpu.matmul %1, %2, %cst {dimension_numbers = #tpu.dot_dimension_numbers<[1], [0], [0], [1], [0, 0, 1, 1], [], []>} : vector<8x784xbf16>, vector<784x128xbf16>, vector<8x128xf32> -> vector<8x128xf32>
    %c0_3 = arith.constant 0 : index
    %c0_4 = arith.constant 0 : index
    %4 = vector.load %arg3[%c0_3, %c0_4] : memref<1x128xf32, #tpu.memory_space<vmem>>, vector<1x128xf32>
    %5 = vector.broadcast %4 : vector<1x128xf32> to vector<8x128xf32>
    %6 = arith.addf %3, %5 : vector<8x128xf32>
    %cst_5 = arith.constant 0.000000e+00 : f32
    %7 = vector.broadcast %cst_5 : f32 to vector<8x128xf32>
    %8 = arith.maximumf %6, %7 : vector<8x128xf32>
    %9 = arith.truncf %8 : vector<8x128xf32> to vector<8x128xbf16>
    %c0_6 = arith.constant 0 : index
    %c0_7 = arith.constant 0 : index
    %10 = vector.load %arg4[%c0_6, %c0_7] : memref<128x256xbf16, #tpu.memory_space<vmem>>, vector<128x256xbf16>
    %cst_8 = arith.constant dense<0.000000e+00> : vector<8x256xf32>
    %11 = tpu.matmul %9, %10, %cst_8 {dimension_numbers = #tpu.dot_dimension_numbers<[1], [0], [0], [1], [0, 0, 1, 1], [], []>} : vector<8x128xbf16>, vector<128x256xbf16>, vector<8x256xf32> -> vector<8x256xf32>
    %c0_9 = arith.constant 0 : index
    %c0_10 = arith.constant 0 : index
    %12 = vector.load %arg5[%c0_9, %c0_10] : memref<1x256xf32, #tpu.memory_space<vmem>>, vector<1x256xf32>
    %13 = vector.broadcast %12 : vector<1x256xf32> to vector<8x256xf32>
    %14 = arith.addf %11, %13 : vector<8x256xf32>
    %cst_11 = arith.constant 0.000000e+00 : f32
    %15 = vector.broadcast %cst_11 : f32 to vector<8x256xf32>
    %16 = arith.maximumf %14, %15 : vector<8x256xf32>
    %17 = arith.truncf %16 : vector<8x256xf32> to vector<8x256xbf16>
    %c0_12 = arith.constant 0 : index
    %c0_13 = arith.constant 0 : index
    %18 = vector.load %arg6[%c0_12, %c0_13] : memref<256x128xbf16, #tpu.memory_space<vmem>>, vector<256x128xbf16>
    %cst_14 = arith.constant dense<0.000000e+00> : vector<8x128xf32>
    %19 = tpu.matmul %17, %18, %cst_14 {dimension_numbers = #tpu.dot_dimension_numbers<[1], [0], [0], [1], [0, 0, 1, 1], [], []>} : vector<8x256xbf16>, vector<256x128xbf16>, vector<8x128xf32> -> vector<8x128xf32>
    %c0_15 = arith.constant 0 : index
    %c0_16 = arith.constant 0 : index
    %20 = vector.load %arg7[%c0_15, %c0_16] : memref<1x128xf32, #tpu.memory_space<vmem>>, vector<1x128xf32>
    %21 = vector.broadcast %20 : vector<1x128xf32> to vector<8x128xf32>
    %22 = arith.addf %19, %21 : vector<8x128xf32>
    %23 = arith.truncf %22 : vector<8x128xf32> to vector<8x128xbf16>
    %c0_17 = arith.constant 0 : index
    %c0_18 = arith.constant 0 : index
    %24 = vector.load %arg8[%c0_17, %c0_18] : memref<8x128xbf16, #tpu.memory_space<vmem>>, vector<8x128xbf16>
    tpu.vector_store %arg8[%c0_17, %c0_18], %23 {strides = array<i32>} : memref<8x128xbf16, #tpu.memory_space<vmem>>, vector<8x128xbf16>,
    return
  }
  func.func @transform_0(%arg0: i32) -> (i32, i32) {
    %c0_i32 = arith.constant 0 : i32
    %c0_i32_0 = arith.constant 0 : i32
    return %arg0, %c0_i32 : i32, i32
  }
  func.func @transform_1(%arg0: i32) -> (i32, i32) {
    %c0_i32 = arith.constant 0 : i32
    %c0_i32_0 = arith.constant 0 : i32
    %c0_i32_1 = arith.constant 0 : i32
    return %c0_i32, %c0_i32_0 : i32, i32
  }
  func.func @transform_2(%arg0: i32) -> (i32, i32) {
    %c0_i32 = arith.constant 0 : i32
    %c0_i32_0 = arith.constant 0 : i32
    %c0_i32_1 = arith.constant 0 : i32
    return %c0_i32, %c0_i32_0 : i32, i32
  }
  func.func @transform_3(%arg0: i32) -> (i32, i32) {
    %c0_i32 = arith.constant 0 : i32
    %c0_i32_0 = arith.constant 0 : i32
    %c0_i32_1 = arith.constant 0 : i32
    return %c0_i32, %c0_i32_0 : i32, i32
  }
  func.func @transform_4(%arg0: i32) -> (i32, i32) {
    %c0_i32 = arith.constant 0 : i32
    %c0_i32_0 = arith.constant 0 : i32
    %c0_i32_1 = arith.constant 0 : i32
    return %c0_i32, %c0_i32_0 : i32, i32
  }
  func.func @transform_5(%arg0: i32) -> (i32, i32) {
    %c0_i32 = arith.constant 0 : i32
    %c0_i32_0 = arith.constant 0 : i32
    %c0_i32_1 = arith.constant 0 : i32
    return %c0_i32, %c0_i32_0 : i32, i32
  }
  func.func @transform_6(%arg0: i32) -> (i32, i32) {
    %c0_i32 = arith.constant 0 : i32
    %c0_i32_0 = arith.constant 0 : i32
    %c0_i32_1 = arith.constant 0 : i32
    return %c0_i32, %c0_i32_0 : i32, i32
  }
  func.func @transform_7(%arg0: i32) -> (i32, i32) {
    %c0_i32 = arith.constant 0 : i32
    %c0_i32_0 = arith.constant 0 : i32
    return %arg0, %c0_i32 : i32, i32
  }
}

</mosaic_0001>

<bundles_post_ra>
// kernel: tpu_custom_call.1
= control target key start
LH: loop header
LB: loop body
LE: loop exit
PB: predicated region body
PF: predicated region fallthrough
CT: control target
= control target key end

     0   :  { %12 = vsyncpa [#allocation3], 0  ;;  %s1600_s0 = inlined_call_operand.hbm [shape: f32[2,784], index: 0, kind: input, shape index: {}]   ;;  %s1601_s1 = inlined_call_operand.hbm [shape: bf16[784,128], index: 1, kind: input, shape index: {}]   ;;  %s1602_s2 = inlined_call_operand.vmem [shape: f32[1,128], index: 2, kind: input, shape index: {}]   ;;  %s1603_s3 = inlined_call_operand.hbm [shape: bf16[128,256], index: 3, kind: input, shape index: {}]   ;;  %s1604_s4 = inlined_call_operand.vmem [shape: f32[1,256], index: 4, kind: input, shape index: {}]   ;;  %s1605_s5 = inlined_call_operand.hbm [shape: bf16[256,128], index: 5, kind: input, shape index: {}]   ;;  %s1606_s6 = inlined_call_operand.vmem [shape: f32[1,128], index: 6, kind: input, shape index: {}]   ;;  %s1607_s7 = inlined_call_operand.hbm [shape: bf16[2,128], index: 7, kind: output, shape index: {}]  }
   0x1   :  { %13 = vsyncpa [#allocation6], 0 }
   0x2   :  { %14 = vsyncpa [#allocation9], 0 }
   0x3   :  { %15 = vsyncpa [#allocation4], 0  ;;  %s33_s26 = sshll.u32 %s1601_s1, 4  ;;  %s34_s26 = int_to_ptr.hbm [resolvable:$true] %s33_s26 }
   0x4   :  { %19 = vsyncadd [#allocation3], 672  ;;  %s1523_s27 = smov [#allocation5]   ;;  %s20_s8 = sshll.u32 %s1600_s0, 4  ;;  %s21_s8 = int_to_ptr.hbm [resolvable:$true] %s20_s8 }
   0x5   :  { %s35_s28 = sshll.u32 %s1523_s27, 4  ;;  %s1524_s9 = smov 64   ;;  %s36_s28 = int_to_ptr.vmem [resolvable:$true] %s35_s28 }
   0x6   :  { %s1525_s10 = smov 4   ;;  %s1526_s11 = smov [#allocation2]  }
   0x7   :  { %41 = dma.hbm_to_vmem [thread:$0]  %s34_s26, 6272, %s36_s28, [#allocation6], %s1524_s9, %s1524_s9, %s1525_s10  }
   0x8   :  { %s22_s12 = sshll.u32 %s1526_s11, 4  ;;  %s1527_s13 = smov 224   ;;  %s23_s12 = int_to_ptr.vmem [resolvable:$true] %s22_s12 }
   0x9   :  { %s1528_s14 = smov 14   ;;  %s48_s16 = sshll.u32 %s1603_s3, 4  ;;  %s49_s16 = int_to_ptr.hbm [resolvable:$true] %s48_s16 }
   0xa   :  { %28 = dma.hbm_to_vmem [thread:$0]  %s21_s8, 224, %s23_s12, [#allocation3], %s1527_s13, %s1527_s13, %s1528_s14  }
   0xb   :  { %s1529_s17 = smov [#allocation7]   ;;  %s63_s20 = sshll.u32 %s1605_s5, 4  ;;  %s64_s20 = int_to_ptr.hbm [resolvable:$true] %s63_s20 }
   0xc   :  { %s50_s18 = sshll.u32 %s1529_s17, 4  ;;  %s1530_s21 = smov 128   ;;  %s51_s18 = int_to_ptr.vmem [resolvable:$true] %s50_s18 }
   0xd   :  { %s1531_s22 = smov 8   ;;  %s1532_s23 = smov [#allocation8]  }
   0xe   :  { %56 = dma.hbm_to_vmem [thread:$0]  %s49_s16, 2048, %s51_s18, [#allocation6], %s1530_s21, %s1530_s21, %s1531_s22  }
   0xf   :  { %s65_s24 = sshll.u32 %s1532_s23, 4  ;;  %s66_s24 = int_to_ptr.vmem [resolvable:$true] %s65_s24 }
  0x10   :  { %71 = dma.hbm_to_vmem [thread:$0]  %s64_s20, 2048, %s66_s24, [#allocation9], %s1524_s9, %s1524_s9, %s1525_s10  }
  0x11   :  { %1515 = dma.done.wait [#allocation3], 896  }
  0x12   :  { %1516 = vsyncadd [#allocation3], 4294966400 }
  0x13   :  { %1517 = dma.done.wait [#allocation6], 8320  }
  0x14   :  { %1518 = vsyncadd [#allocation6], 4294958976 }
  0x15   :  { %1519 = dma.done.wait [#allocation9], 2048  }
  0x16   :  { %1520 = vsyncadd [#allocation9], 4294965248  ;;  %v1306_v0 = vld [vmem:[#allocation5 + $0x38] sm:$0xff]  ;;  %v1305_v3 = vld [vmem:[#allocation5 + $0x30] sm:$0xff]  ;;  %vm539_vm0 = vcmask 130048   ;;  %vm929_vm1 = vcmask 1040384  }
  0x17   :  { %v1314_v1 = vld [vmem:[#allocation5 + $0x78] sm:$0xff]  ;;  %543 = vmatpush.bf16.msra.mxu0 %v1306_v0  ;;  %v1313_v4 = vld [vmem:[#allocation5 + $0x70] sm:$0xff]  ;;  %v1304_v8 = vld [vmem:[#allocation5 + $0x28] sm:$0xff]  ;;  %vm933_vm2 = vcmask 1041409   ;;  %vm937_vm3 = vcmask 1042434   ;;  %vm941_vm4 = vcmask 1043459  }
  0x18   :  { %v1322_v2 = vld [vmem:[#allocation5 + $0xb8] sm:$0xff]  ;;  %556 = vmatpush.bf16.msra.mxu1 %v1314_v1  ;;  %v1321_v5 = vld [vmem:[#allocation5 + $0xb0] sm:$0xff]  ;;  %v1312_v9 = vld [vmem:[#allocation5 + $0x68] sm:$0xff] }
  0x19   :  { %569 = vmatpush.bf16.msra.mxu2 %v1322_v2  ;;  %v1330_v6 = vld [vmem:[#allocation5 + $0xf8] sm:$0xff]  ;;  %v1329_v7 = vld [vmem:[#allocation5 + $0xf0] sm:$0xff]  ;;  %v1320_v10 = vld [vmem:[#allocation5 + $0xa8] sm:$0xff] }
  0x1a   :  { %582 = vmatpush.bf16.msra.mxu3 %v1330_v6  ;;  %v1328_v11 = vld [vmem:[#allocation5 + $0xe8] sm:$0xff]  ;;  %v1303_v12 = vld [vmem:[#allocation5 + $0x20] sm:$0xff]  ;;  %v93_v16 = vld [vmem:[#allocation2 + $0xe] sm:$0xff] }
  0x1b   :  { %544 = vmatpush.bf16.msra.mxu0 %v1305_v3  ;;  %v1311_v13 = vld [vmem:[#allocation5 + $0x60] sm:$0xff]  ;;  %v91_v15 = vld [vmem:[#allocation2] sm:$0xff]  ;;  %v97_v18 = vld [vmem:[#allocation2 + $0x2a] sm:$0xff]  ;;  %109 = vst [vmem:[#allocation1 + $0x1] ss:$4 sm:$0xff] %v93_v16 }
  0x1c   :  { %557 = vmatpush.bf16.msra.mxu1 %v1313_v4  ;;  %v1319_v14 = vld [vmem:[#allocation5 + $0xa0] sm:$0xff]  ;;  %107 = vst [vmem:[#allocation1] ss:$4 sm:$0xff] %v91_v15  ;;  %v1302_v20 = vld [vmem:[#allocation5 + $0x18] sm:$0xff]  ;;  %v1301_v23 = vld [vmem:[#allocation5 + $0x10] sm:$0xff] }
  0x1d   :  { %570 = vmatpush.bf16.msra.mxu2 %v1321_v5  ;;  %v95_v17 = vld [vmem:[#allocation2 + $0x1c] sm:$0xff]  ;;  %v1310_v21 = vld [vmem:[#allocation5 + $0x58] sm:$0xff]  ;;  %113 = vst [vmem:[#allocation1 + $0x3] ss:$4 sm:$0xff] %v97_v18  ;;  %v92_v24 = vld [vmem:[#allocation2 + $0x8] sm:$0x3f] }
  0x1e   :  { %583 = vmatpush.bf16.msra.mxu3 %v1329_v7  ;;  %v1327_v19 = vld [vmem:[#allocation5 + $0xe0] sm:$0xff]  ;;  %111 = vst [vmem:[#allocation1 + $0x2] ss:$4 sm:$0xff] %v95_v17  ;;  %v1318_v22 = vld [vmem:[#allocation5 + $0x98] sm:$0xff]  ;;  %v96_v26 = vld [vmem:[#allocation2 + $0x24] sm:$0x3f] }
  0x1f   :  { %545 = vmatpush.bf16.msra.mxu0 %v1304_v8  ;;  %v94_v25 = vld [vmem:[#allocation2 + $0x16] sm:$0x3f]  ;;  %v1309_v27 = vld [vmem:[#allocation5 + $0x50] sm:$0xff]  ;;  %115 = vst [vmem:[#allocation1 + $0x20] ss:$4 sm:$0xff] %v92_v24  ;;  %v1300_v32 = vld [vmem:[#allocation5 + $0x8] sm:$0xff] }
  0x20   :  { %558 = vmatpush.bf16.msra.mxu1 %v1312_v9  ;;  %v1326_v28 = vld [vmem:[#allocation5 + $0xd8] sm:$0xff]  ;;  %117 = vst [vmem:[#allocation1 + $0x21] ss:$4 sm:$0xff] %v94_v25  ;;  %v1317_v30 = vld [vmem:[#allocation5 + $0x90] sm:$0xff]  ;;  %v1308_v33 = vld [vmem:[#allocation5 + $0x48] sm:$0xff] }
  0x21   :  { %571 = vmatpush.bf16.msra.mxu2 %v1320_v10  ;;  %v98_v29 = vld [vmem:[#allocation2 + $0x32] sm:$0x3f]  ;;  %119 = vst [vmem:[#allocation1 + $0x22] ss:$4 sm:$0xff] %v96_v26  ;;  %v1325_v31 = vld [vmem:[#allocation5 + $0xd0] sm:$0xff]  ;;  %v1316_v34 = vld [vmem:[#allocation5 + $0x88] sm:$0xff] }
  0x22   :  { %584 = vmatpush.bf16.msra.mxu3 %v1328_v11  ;;  %121 = vst [vmem:[#allocation1 + $0x23] ss:$4 sm:$0xff] %v98_v29  ;;  %v1299_v35 = vld [vmem:[#allocation5] sm:$0xff]  ;;  %v1324_v37 = vld [vmem:[#allocation5 + $0xc8] sm:$0xff]  ;;  %v1338_v40 = vld [vmem:[#allocation5 + $0x138] sm:$0xff] }
  0x23   :  { %546 = vmatpush.bf16.msra.mxu0 %v1303_v12  ;;  %v1307_v36 = vld [vmem:[#allocation5 + $0x40] sm:$0xff]  ;;  %v1346_v41 = vld [vmem:[#allocation5 + $0x178] sm:$0xff]  ;;  %v1337_v49 = vld [vmem:[#allocation5 + $0x130] sm:$0xff] }
  0x24   :  { %559 = vmatpush.bf16.msra.mxu1 %v1311_v13  ;;  %v1315_v42 = vld [vmem:[#allocation5 + $0x80] sm:$0xff]  ;;  %v1345_v50 = vld [vmem:[#allocation5 + $0x170] sm:$0xff]  ;;  %v1336_v53 = vld [vmem:[#allocation5 + $0x128] sm:$0xff] }
  0x25   :  { %572 = vmatpush.bf16.msra.mxu2 %v1319_v14  ;;  %v122_v38 = vld.sshfl [vmem:[#allocation1] sm:$0xff pattern:$0x73625140]  ;;  %v123_v39 = vld.sshfl [vmem:[#allocation1 + $0x8] sm:$0xff pattern:$0x73625140] }
  0x26   :  { %585 = vmatpush.bf16.msra.mxu3 %v1327_v19  ;;  %v124_v43 = vld.sshfl [vmem:[#allocation1 + $0x10] sm:$0xff pattern:$0x73625140]  ;;  %v136_v44 = vpack.c.bf16 %v122_v38, %v122_v38  ;;  %v137_v45 = vpack.c.bf16 %v123_v39, %v123_v39  ;;  %v1323_v46 = vld [vmem:[#allocation5 + $0xc0] sm:$0xff]  ;;  %v1344_v54 = vld [vmem:[#allocation5 + $0x168] sm:$0xff] }
  0x27   :  { %547 = vmatpush.bf16.msra.mxu0 %v1302_v20  ;;  %v1347_v47 = vld [vmem:[#allocation5 + $0x180] sm:$0xff]  ;;  %v125_v48 = vld.sshfl [vmem:[#allocation1 + $0x18] sm:$0xff pattern:$0x73625140]  ;;  %v138_v51 = vpack.c.bf16 %v124_v43, %v124_v43  ;;  %v1333_v60 = vld [vmem:[#allocation5 + $0x110] sm:$0xff] }
  0x28   :  { %560 = vmatpush.bf16.msra.mxu1 %v1310_v21  ;;  %v139_v52 = vpack.c.bf16 %v125_v48, %v125_v48  ;;  %v1335_v55 = vld [vmem:[#allocation5 + $0x120] sm:$0xff]  ;;  %v1334_v57 = vld [vmem:[#allocation5 + $0x118] sm:$0xff]  ;;  %v1341_v61 = vld [vmem:[#allocation5 + $0x150] sm:$0xff] }
  0x29   :  { %573 = vmatpush.bf16.msra.mxu2 %v1318_v22  ;;  %v1343_v56 = vld [vmem:[#allocation5 + $0x160] sm:$0xff]  ;;  %v1342_v58 = vld [vmem:[#allocation5 + $0x158] sm:$0xff]  ;;  %v128_v59 = vld.sshfl [vmem:[#allocation1 + $0x30] sm:$0xff pattern:$0x73625140] }
  0x2a   :  { %586 = vmatpush.bf16.msra.mxu3 %v1326_v28  ;;  %v142_v62 = vpack.c.bf16 %v128_v59, %v128_v59  ;;  %v1332_v63 = vld [vmem:[#allocation5 + $0x108] sm:$0xff]  ;;  %v1331_v1 = vld [vmem:[#allocation5 + $0x100] sm:$0xff]  ;;  %v1229_v7 = vld [vmem:[#allocation7 + $0x70] sm:$0xf] }
  0x2b   :  { %548 = vmatpush.bf16.msra.mxu0 %v1301_v23  ;;  %v1340_v0 = vld [vmem:[#allocation5 + $0x148] sm:$0xff]  ;;  %v1339_v2 = vld [vmem:[#allocation5 + $0x140] sm:$0xff]  ;;  %v1362_v9 = vld [vmem:[#allocation7 + $0x74] sm:$0xf] }
  0x2c   :  { %561 = vmatpush.bf16.msra.mxu1 %v1309_v27  ;;  %v126_v3 = vld.sshfl [vmem:[#allocation1 + $0x20] sm:$0xff pattern:$0x73625140]  ;;  %v127_v4 = vld.sshfl [vmem:[#allocation1 + $0x28] sm:$0xff pattern:$0x73625140] }
  0x2d   :  { %574 = vmatpush.bf16.msra.mxu2 %v1317_v30  ;;  %v140_v5 = vpack.c.bf16 %v126_v3, %v126_v3  ;;  %v141_v6 = vpack.c.bf16 %v127_v4, %v127_v4  ;;  %v1363_v8 = vld [vmem:[#allocation7 + $0x74] sm:$0xf0]  ;;  %v1231_v11 = vld [vmem:[#allocation7 + $0x78] sm:$0xf0]  ;;  %v1221_v13 = vld [vmem:[#allocation7 + $0x60] sm:$0xf] }
  0x2e   :  { %587 = vmatpush.bf16.msra.mxu3 %v1325_v31  ;;  %v1230_v10 = vor.u32 %v1363_v8, %v1229_v7  ;;  %v1234_v12 = vor.u32 %v1362_v9, %v1231_v11  ;;  %v1361_v14 = vld [vmem:[#allocation7 + $0x64] sm:$0xf0]  ;;  %v1360_v15 = vld [vmem:[#allocation7 + $0x64] sm:$0xf]  ;;  %v1223_v17 = vld [vmem:[#allocation7 + $0x68] sm:$0xf0] }
  0x2f   :  { %549 = vmatpush.bf16.msra.mxu0 %v1300_v32  ;;  %v1222_v16 = vor.u32 %v1361_v14, %v1221_v13  ;;  %v1226_v18 = vor.u32 %v1360_v15, %v1223_v17  ;;  %v1213_v19 = vld [vmem:[#allocation7 + $0x50] sm:$0xf]  ;;  %v1359_v20 = vld [vmem:[#allocation7 + $0x54] sm:$0xf0]  ;;  %v1358_v21 = vld [vmem:[#allocation7 + $0x54] sm:$0xf] }
  0x30   :  { %562 = vmatpush.bf16.msra.mxu1 %v1308_v33  ;;  %v1214_v22 = vor.u32 %v1359_v20, %v1213_v19  ;;  %v1215_v23 = vld [vmem:[#allocation7 + $0x58] sm:$0xf0]  ;;  %v1205_v25 = vld [vmem:[#allocation7 + $0x40] sm:$0xf]  ;;  %v1357_v26 = vld [vmem:[#allocation7 + $0x44] sm:$0xf0] }
  0x31   :  { %575 = vmatpush.bf16.msra.mxu2 %v1316_v34  ;;  %v1218_v24 = vor.u32 %v1358_v21, %v1215_v23  ;;  %v1356_v27 = vld [vmem:[#allocation7 + $0x44] sm:$0xf]  ;;  %v1206_v28 = vor.u32 %v1357_v26, %v1205_v25  ;;  %v1207_v29 = vld [vmem:[#allocation7 + $0x48] sm:$0xf0]  ;;  %v1197_v31 = vld [vmem:[#allocation7 + $0x30] sm:$0xf] }
  0x32   :  { %588 = vmatpush.bf16.msra.mxu3 %v1324_v37  ;;  %v1210_v30 = vor.u32 %v1356_v27, %v1207_v29  ;;  %v1355_v32 = vld [vmem:[#allocation7 + $0x34] sm:$0xf0]  ;;  %v1354_v33 = vld [vmem:[#allocation7 + $0x34] sm:$0xf]  ;;  %v1189_v37 = vld [vmem:[#allocation7 + $0x20] sm:$0xf] }
  0x33   :  { %550 = vmatpush.bf16.msra.mxu0 %v1299_v35  ;;  %v1198_v34 = vor.u32 %v1355_v32, %v1197_v31  ;;  %v1199_v35 = vld [vmem:[#allocation7 + $0x38] sm:$0xf0]  ;;  %v1353_v38 = vld [vmem:[#allocation7 + $0x24] sm:$0xf0]  ;;  %v1352_v39 = vld [vmem:[#allocation7 + $0x24] sm:$0xf] }
  0x34   :  { %563 = vmatpush.bf16.msra.mxu1 %v1307_v36  ;;  %v1202_v36 = vor.u32 %v1354_v33, %v1199_v35  ;;  %v1181_v43 = vld [vmem:[#allocation7 + $0x10] sm:$0xf]  ;;  %v1371_v59 = vld [vmem:[#allocation8 + $0x38] sm:$0xff]  ;;  %v1377_v3 = vld [vmem:[#allocation8 + $0x68] sm:$0xff] }
  0x35   :  { %576 = vmatpush.bf16.msra.mxu2 %v1315_v42  ;;  %v1368_v7 = vld [vmem:[#allocation8 + $0x20] sm:$0xff]  ;;  %v1375_v11 = vld [vmem:[#allocation8 + $0x58] sm:$0xff]  ;;  %v1366_v14 = vld [vmem:[#allocation8 + $0x10] sm:$0xff] }
  0x36   :  { %551 = vmatmul.bf16.vlgmr.msra.gmra.mxu0 %v136_v44  ;;  %589 = vmatpush.bf16.msra.mxu3 %v1323_v46  ;;  %v1351_v44 = vld [vmem:[#allocation7 + $0x14] sm:$0xf0]  ;;  %v1376_v8 = vld [vmem:[#allocation8 + $0x60] sm:$0xff]  ;;  %v1374_v15 = vld [vmem:[#allocation8 + $0x50] sm:$0xff] }
  0x37   :  { %595 = vmatpush.bf16.msrb.mxu0 %v1338_v40  ;;  %564 = vmatmul.bf16.vlgmr.msra.gmra.mxu1 %v137_v45  ;;  %v1190_v40 = vor.u32 %v1353_v38, %v1189_v37  ;;  %v1350_v45 = vld [vmem:[#allocation7 + $0x14] sm:$0xf]  ;;  %v1182_v46 = vor.u32 %v1351_v44, %v1181_v43  ;;  %v1365_v27 = vld [vmem:[#allocation8 + $0x8] sm:$0xff]  ;;  %v1364_v29 = vld [vmem:[#allocation8] sm:$0xff] }
  0x38   :  { %608 = vmatpush.bf16.msrb.mxu1 %v1346_v41  ;;  %577 = vmatmul.bf16.vlgmr.msra.gmra.mxu2 %v138_v51  ;;  %v1191_v41 = vld [vmem:[#allocation7 + $0x28] sm:$0xf0]  ;;  %v1173_v51 = vld [vmem:[#allocation7] sm:$0xf]  ;;  %v652_v31 = vld [vmem:[%s1604_s4] sm:$0x3] }
  0x39   :  { %628 = vmatpush.bf16.msrb.mxu2 %v1347_v47  ;;  %590 = vmatmul.bf16.vlgmr.msra.gmra.mxu3 %v139_v52  ;;  %v1194_v42 = vor.u32 %v1352_v39, %v1191_v41  ;;  %v1183_v47 = vld [vmem:[#allocation7 + $0x18] sm:$0xf0]  ;;  %v1349_v52 = vld [vmem:[#allocation7 + $0x4] sm:$0xf0]  ;;  %v654_v32 = vperm.slane %v652_v31, 0  ;;  %v655_v33 = vperm.slane %v652_v31, 1 }
  0x3a   :  { %738 = vmatpush.bf16.msrb.mxu3 %v1230_v10  ;;  %v1367_v10 = vld [vmem:[#allocation8 + $0x18] sm:$0xff] }
  0x3b   :  { %596 = vmatpush.bf16.msrb.mxu0 %v1337_v49  ;;  %v1394_v44 = vld [vmem:[%s1606_s6] ss:$0 sm:$0xff] }
  0x3c   :  { %609 = vmatpush.bf16.msrb.mxu1 %v1345_v50  ;;  %v1186_v50 = vor.u32 %v1350_v45, %v1183_v47 }
  0x3d   :  { %751 = vmatpush.bf16.msra.mxu2 %v1234_v12 }
  0x3e   :  { %739 = vmatpush.bf16.msrb.mxu3 %v1222_v16 }
  0x3f   :  { %597 = vmatpush.bf16.msrb.mxu0 %v1336_v53  ;;  %v1348_v53 = vld [vmem:[#allocation7 + $0x4] sm:$0xf] }
  0x40   :  { %610 = vmatpush.bf16.msrb.mxu1 %v1344_v54  ;;  %v1174_v54 = vor.u32 %v1349_v52, %v1173_v51 }
  0x41   :  { %752 = vmatpush.bf16.msra.mxu2 %v1226_v18 }
  0x42   :  { %740 = vmatpush.bf16.msrb.mxu3 %v1214_v22 }
  0x43   :  { %598 = vmatpush.bf16.msrb.mxu0 %v1335_v55  ;;  %v1175_v55 = vld [vmem:[#allocation7 + $0x8] sm:$0xf0] }
  0x44   :  { %611 = vmatpush.bf16.msrb.mxu1 %v1343_v56  ;;  %v1178_v56 = vor.u32 %v1348_v53, %v1175_v55 }
  0x45   :  { %753 = vmatpush.bf16.msra.mxu2 %v1218_v24 }
  0x46   :  { %741 = vmatpush.bf16.msrb.mxu3 %v1206_v28  ;;  %v1373_v28 = vld [vmem:[#allocation8 + $0x48] sm:$0xff] }
  0x47   :  { %599 = vmatpush.bf16.msrb.mxu0 %v1334_v57 }
  0x48   :  { %612 = vmatpush.bf16.msrb.mxu1 %v1342_v58  ;;  %1170 = vmatmul.msk.bf16.vlgmr.msrb.gmra.mxu2 %vm539_vm0, %v142_v62 }
  0x49   :  { %754 = vmatpush.bf16.msra.mxu2 %v1210_v30  ;;  %v1372_v30 = vld [vmem:[#allocation8 + $0x40] sm:$0xff] }
  0x4a   :  { %742 = vmatpush.bf16.msrb.mxu3 %v1198_v34 }
  0x4b   :  { %600 = vmatpush.bf16.msrb.mxu0 %v1333_v60  ;;  %v1379_v60 = vld [vmem:[#allocation8 + $0x78] sm:$0xff] }
  0x4c   :  { %613 = vmatpush.bf16.msrb.mxu1 %v1341_v61 }
  0x4d   :  { %755 = vmatpush.bf16.msra.mxu2 %v1202_v36 }
  0x4e   :  { %743 = vmatpush.bf16.msrb.mxu3 %v1190_v40 }
  0x4f   :  { %601 = vmatpush.bf16.msrb.mxu0 %v1332_v63  ;;  %v1370_v63 = vld [vmem:[#allocation8 + $0x30] sm:$0xff] }
  0x50   :  { %614 = vmatpush.bf16.msrb.mxu1 %v1340_v0  ;;  %v1378_v0 = vld [vmem:[#allocation8 + $0x70] sm:$0xff] }
  0x51   :  { %756 = vmatpush.bf16.msra.mxu2 %v1194_v42 }
  0x52   :  { %744 = vmatpush.bf16.msrb.mxu3 %v1182_v46 }
  0x53   :  { %602 = vmatpush.bf16.msrb.mxu0 %v1331_v1  ;;  %v1393_v1 = vld [vmem:[%s1602_s2] ss:$0 sm:$0xff] }
  0x54   :  { %615 = vmatpush.bf16.msrb.mxu1 %v1339_v2  ;;  %v1369_v2 = vld [vmem:[#allocation8 + $0x28] sm:$0xff] }
  0x55   :  { %757 = vmatpush.bf16.msra.mxu2 %v1186_v50 }
  0x56   :  { %603 = vmatmul.bf16.vlgmr.msrb.gmra.mxu0 %v140_v5  ;;  %745 = vmatpush.bf16.msrb.mxu3 %v1174_v54 }
  0x57   :  { %616 = vmatmul.bf16.vlgmr.msrb.gmra.mxu1 %v141_v6  ;;  %900 = vmatpush.bf16.msra.mxu0 %v1371_v59 }
  0x58   :  { %913 = vmatpush.bf16.msra.mxu1 %v1379_v60 }
  0x59   :  { %758 = vmatpush.bf16.msra.mxu2 %v1178_v56 }
  0x5b   :  { %901 = vmatpush.bf16.msra.mxu0 %v1370_v63 }
  0x5c   :  { %914 = vmatpush.bf16.msra.mxu1 %v1378_v0 }
  0x5f   :  { %902 = vmatpush.bf16.msra.mxu0 %v1369_v2 }
  0x60   :  { %915 = vmatpush.bf16.msra.mxu1 %v1377_v3 }
  0x63   :  { %903 = vmatpush.bf16.msra.mxu0 %v1368_v7 }
  0x64   :  { %916 = vmatpush.bf16.msra.mxu1 %v1376_v8 }
  0x67   :  { %904 = vmatpush.bf16.msra.mxu0 %v1367_v10 }
  0x68   :  { %917 = vmatpush.bf16.msra.mxu1 %v1375_v11 }
  0x6b   :  { %905 = vmatpush.bf16.msra.mxu0 %v1366_v14 }
  0x6c   :  { %918 = vmatpush.bf16.msra.mxu1 %v1374_v15 }
  0x6f   :  { %906 = vmatpush.bf16.msra.mxu0 %v1365_v27 }
  0x70   :  { %919 = vmatpush.bf16.msra.mxu1 %v1373_v28 }
  0x73   :  { %907 = vmatpush.bf16.msra.mxu0 %v1364_v29 }
  0x74   :  { %920 = vmatpush.bf16.msra.mxu1 %v1372_v30 }
  0xb3   :  { %v552_v48 = vpop.f32.mrf.mxu0 }
  0xb4   :  { %v565_v49 = vpop.f32.mrf.mxu1  ;;  %v553_v4 = vadd.f32 %v1393_v1, %v552_v48 }
  0xb6   :  { %v566_v9 = vadd.f32 %v565_v49, %v553_v4 }
  0xbb   :  { %v554_v57 = vpop.f32.mrf.mxu0  ;;  %v578_v61 = vpop.f32.mrf.mxu2 }
  0xbc   :  { %v567_v58 = vpop.f32.mrf.mxu1  ;;  %v591_v62 = vpop.f32.mrf.mxu3  ;;  %v579_v12 = vadd.f32 %v578_v61, %v566_v9 }
  0xbe   :  { %v592_v16 = vadd.f32 %v591_v62, %v579_v12 }
  0xc3   :  { %v580_v5 = vpop.f32.mrf.mxu2 }
  0xc4   :  { %v593_v6 = vpop.f32.mrf.mxu3 }
  0xcb   :  { %v630_v13 = vpop.f32.mrf.mxu2 }
  0xd3   :  { %v604_v17 = vpop.f32.mrf.mxu0  ;;  %v632_v21 = vpop.f32.mrf.mxu2 }
  0xd4   :  { %v617_v18 = vpop.f32.mrf.mxu1  ;;  %v605_v19 = vadd.f32 %v604_v17, %v592_v16 }
  0xd6   :  { %v618_v20 = vadd.f32 %v617_v18, %v605_v19 }
  0xd8   :  { %v631_v22 = vadd.f32 %v630_v13, %v618_v20 }
  0xda   :  { %v634_v23 = vmax.f32 %v631_v22, 0.0 }
  0xdb   :  { %v606_v24 = vpop.f32.mrf.mxu0 }
  0xdc   :  { %v619_v25 = vpop.f32.mrf.mxu1  ;;  %v635_v26 = vpack.c.bf16 %v634_v23, %v634_v23 }
  0xde   :  { %746 = vmatmul.bf16.vlgmr.msrb.gmra.mxu3 %v635_v26  ;;  %759 = vmatmul.bf16.vlgmr.msra.gmra.mxu2 %v635_v26 }
 0x161   :  { %v747_v34 = vpop.f32.mrf.mxu3  ;;  %v760_v35 = vpop.f32.mrf.mxu2 }
 0x162   :  { %v748_v36 = vadd.f32 %v747_v34, %v654_v32  ;;  %v761_v37 = vadd.f32 %v760_v35, %v655_v33 }
 0x164   :  { %v764_v38 = vmax.f32 %v748_v36, 0.0  ;;  %v765_v39 = vmax.f32 %v761_v37, 0.0 }
 0x166   :  { %v766_v40 = vpack.c.bf16 %v764_v38, %v764_v38  ;;  %v767_v41 = vpack.c.bf16 %v765_v39, %v765_v39 }
 0x168   :  { %908 = vmatmul.bf16.vlgmr.msra.gmra.mxu0 %v766_v40  ;;  %921 = vmatmul.bf16.vlgmr.msra.gmra.mxu1 %v767_v41 }
 0x169   :  { %v749_v42 = vpop.f32.mrf.mxu3  ;;  %v762_v43 = vpop.f32.mrf.mxu2 }
 0x1e5   :  { %v909_v45 = vpop.f32.mrf.mxu0  ;;  %v922_v46 = vpop.f32.mrf.mxu1 }
 0x1e6   :  { %v910_v47 = vadd.f32 %v1394_v44, %v909_v45 }
 0x1e8   :  { %v923_v48 = vadd.f32 %v922_v46, %v910_v47 }
 0x1ea   :  { %v926_v49 = vpack.c.bf16 %v923_v48, %v923_v48 }
 0x1ec   :  { %v928_v50 = vrot.slane %v926_v49, 3 }
 0x1ed   :  { %v911_v51 = vpop.f32.mrf.mxu0  ;;  %v924_v52 = vpop.f32.mrf.mxu1 }
 0x1ee   :  { %v932_v53 = vsel %vm929_vm1, %v926_v49, %v928_v50  ;;  %v934_v54 = vsel %vm933_vm2, %v926_v49, %v928_v50  ;;  %v938_v55 = vsel %vm937_vm3, %v926_v49, %v928_v50  ;;  %v942_v56 = vsel %vm941_vm4, %v926_v49, %v928_v50 }
 0x1ef   :  { %v936_v57 = vrot.slane %v934_v54, 1  ;;  %v940_v58 = vrot.slane %v938_v55, 2  ;;  %v944_v59 = vrot.slane %v942_v56, 3  ;;  %949 = vst [vmem:[#allocation10] sm:$0x1] %v932_v53 }
 0x1f1   :  { %950 = vst [vmem:[#allocation10 + $0x1] sm:$0x1] %v936_v57 }
 0x1f2   :  { %951 = vst [vmem:[#allocation10 + $0x2] sm:$0x1] %v940_v58 }
 0x1f3   :  { %952 = vst [vmem:[#allocation10 + $0x3] sm:$0x1] %v944_v59 }
 0x1f4   :  { %956 = vsyncadd [#allocation4], 48  ;;  %s959_s28 = sshll.u32 %s1607_s7, 4  ;;  %s1533_s29 = smov [#allocation10]   ;;  %s960_s28 = int_to_ptr.hbm [resolvable:$true] %s959_s28 }
 0x1f5   :  { %s957_s30 = sshll.u32 %s1533_s29, 4  ;;  %s1534_s8 = smov 16   ;;  %s958_s30 = int_to_ptr.vmem [resolvable:$true] %s957_s30 }
 0x1f6   :  { %s1535_s9 = smov 1  }
 0x1f7   :  { %965 = dma.vmem_to_hbm [thread:$0]  %s958_s30, 16, %s960_s28, [#allocation4], %s1534_s8, %s1534_s8, %s1535_s9  }
 0x1f8   :  { %1521 = dma.done.wait [#allocation4], 64  }
 0x1f9   :  { %1522 = vsyncadd [#allocation4], 4294967232 }
 0x1fa   :  { %970 = vsyncpa [#allocation3], 1 }
 0x1fb   :  { %971 = vsyncpa [#allocation6], 1 }
 0x1fc   :  { %972 = vsyncpa [#allocation9], 1 }
 0x1fd   :  { %973 = vsyncpa [#allocation4], 1 }

</bundles_post_ra>
